<compile_context>
chip_gen: v7x
topology: tpu7x:2x2x1
jax: 0.10.0
libtpu: 0.0.40
codegen_flags: <defaults>
</compile_context>

<pallas_src>
import functools

import jax
import jax.numpy as jnp
from jax.experimental import pallas as pl
from jax.experimental.pallas import tpu as pltpu


def fm_kernel(e_ref, ft_ref, wfb_ref, wsq_ref, bias_ref, out_ref):
    # e    : [D,   TB]  (user_emb + item_emb).T, stream dtype (bf16 or f32)
    # ft   : [F,   TB]  concatenated feature values.T, stream dtype
    # wfb  : [D+1, F ]  rows 0..D-1 = W.T, row D = feature-bias vector (resident, f32)
    # wsq  : [1,   F ]  column sums of (W.T)^2 (resident, f32)
    # bias : [1,   TB]  user_bias + item_bias + offset - 0.5*sum_d(ue^2+ie^2)
    # out  : [1,   TB]  lane-dense output block (unmasked full-lane stores)
    d = e_ref.shape[0]
    e = e_ref[...].astype(jnp.float32)
    ft = ft_ref[...].astype(jnp.float32)

    # One MXU matmul covers both the field sum and the feature bias.
    m = jnp.dot(wfb_ref[...], ft, preferred_element_type=jnp.float32)   # [D+1, TB]
    s = e + m[:d, :]                                                     # [D, TB]

    pow_of_sum = jnp.sum(s * s, axis=0, keepdims=True)                   # [1, TB]
    sum_of_pow = jnp.dot(wsq_ref[...], ft * ft,
                         preferred_element_type=jnp.float32)             # [1, TB]
    feat_bias = m[d:d + 1, :]                                            # [1, TB]

    out_ref[...] = 0.5 * (pow_of_sum - sum_of_pow) + feat_bias + bias_ref[...]


def fm_forward(params, user_ids, item_ids, user_feats, item_feats,
               train=True, tile_b=2048, stream_dtype=jnp.bfloat16):
    """FM.forward — returns [B] float32 predictions."""
    B = user_ids.shape[0]
    D = params["embedding_user"].shape[1]
    Fu = params["embedding_user_feats"].shape[0]

    # --- tile sizing: big lane-dense tiles, but always >= 2 grid steps so the
    # "parallel" axis can shard across both TensorCores on v7x.
    tile_b = max(128, (int(tile_b) // 128) * 128)
    two_step_cap = max(128, ((-(-B // 2) + 127) // 128) * 128)
    tile_b = min(tile_b, two_step_cap)
    b_pad = ((B + tile_b - 1) // tile_b) * tile_b
    pad = b_pad - B

    # --- plain-JAX glue: gathers + low-rank update on gathered rows only ---
    user_emb = params["embedding_user"][user_ids].astype(jnp.float32)        # [B, D]
    if train:
        item_emb = (params["embedding_item"][item_ids]
                    + params["A"][item_ids] @ params["B"]).astype(jnp.float32)
    else:
        item_emb = params["embedding_item"][item_ids].astype(jnp.float32)
    e = user_emb + item_emb                                                  # [B, D]

    # user/item biases, offset, and the -0.5*sum(ue^2+ie^2) correction, all in
    # the same fusion as the gathers (single lane-dense [1, B] stream).
    bias_row = (params["user_bias"][user_ids]
                + params["item_bias"][item_ids]
                + params["offset"][0]
                - 0.5 * (jnp.sum(user_emb * user_emb, axis=-1)
                         + jnp.sum(item_emb * item_emb, axis=-1)))           # [B]

    if Fu > 0:
        feats = jnp.concatenate([user_feats, item_feats], axis=-1)
        w = jnp.concatenate([params["embedding_user_feats"],
                             params["embedding_item_feats"]], axis=0)
        fb = jnp.concatenate([params["user_feat_bias"],
                              params["item_feat_bias"]])
    else:
        # Module only defines user-feature params when num_user_feats > 0.
        feats = item_feats
        w = params["embedding_item_feats"]
        fb = params["item_feat_bias"]
    f_tot = feats.shape[1]

    # transpose so batch sits on the lane axis inside the kernel; cast streamed
    # activations to stream_dtype (bf16 halves HBM bytes on this mem-bound kernel)
    e_t = e.T.astype(stream_dtype)                    # [D, B]
    ft_t = feats.T.astype(stream_dtype)               # [F, B]
    bias_row = bias_row.reshape(1, B)                 # [1, B] (stays f32)
    if pad:
        e_t = jnp.pad(e_t, ((0, 0), (0, pad)))
        ft_t = jnp.pad(ft_t, ((0, 0), (0, pad)))
        bias_row = jnp.pad(bias_row, ((0, 0), (0, pad)))

    # resident weights (DMA'd once, stay in VMEM)
    w_t = w.astype(jnp.float32).T                                          # [D, F]
    wfb = jnp.concatenate(
        [w_t, fb.astype(jnp.float32).reshape(1, f_tot)], axis=0)           # [D+1, F]
    wsq = jnp.sum(w_t * w_t, axis=0, keepdims=True)                        # [1, F]

    n_steps = b_pad // tile_b
    out = pl.pallas_call(
        fm_kernel,
        out_shape=jax.ShapeDtypeStruct((1, b_pad), jnp.float32),
        grid_spec=pltpu.PrefetchScalarGridSpec(
            num_scalar_prefetch=0,
            grid=(n_steps,),
            in_specs=[
                pl.BlockSpec((D, tile_b), lambda i: (0, i)),        # e_t
                pl.BlockSpec((f_tot, tile_b), lambda i: (0, i)),    # ft_t
                pl.BlockSpec((D + 1, f_tot), lambda i: (0, 0)),     # wfb (resident)
                pl.BlockSpec((1, f_tot), lambda i: (0, 0)),         # wsq (resident)
                pl.BlockSpec((1, tile_b), lambda i: (0, i)),        # bias row
            ],
            out_specs=pl.BlockSpec((1, tile_b), lambda i: (0, i)),
        ),
        compiler_params=pltpu.CompilerParams(
            dimension_semantics=("parallel",),
            vmem_limit_bytes=32 * 1024 * 1024),
    )(e_t, ft_t, wfb, wsq, bias_row)

    return out[0, :B]   # [B]


def fm_forward_ref(params, user_ids, item_ids, user_feats, item_feats,
                   train=True):
    """Pure-JAX reference mirroring the PyTorch forward literally."""
    if train:
        item_table = params["A"] @ params["B"] + params["embedding_item"]
    else:
        item_table = params["embedding_item"]
    user_embs = params["embedding_user"][user_ids][:, None, :]          # [B,1,D]
    item_embs = item_table[item_ids][:, None, :]                        # [B,1,D]
    user_feat_embs = jnp.einsum("ij,ki->kij",
                                params["embedding_user_feats"], user_feats)
    item_feat_embs = jnp.einsum("ij,ki->kij",
                                params["embedding_item_feats"], item_feats)
    all_embs = jnp.concatenate(
        [user_embs, item_embs, user_feat_embs, item_feat_embs], axis=1)
    pow_of_sum = jnp.sum(all_embs, axis=1) ** 2
    sum_of_pow = jnp.sum(all_embs ** 2, axis=1)
    fm_out = jnp.sum(pow_of_sum - sum_of_pow, axis=-1) * 0.5
    feat_bias = jnp.concatenate(
        [params["user_feat_bias"][None, :] * user_feats,
         params["item_feat_bias"][None, :] * item_feats], axis=-1)
    user_biases = params["user_bias"][user_ids][:, None]
    x_biases = jnp.concatenate(
        [user_biases, params["item_bias"][item_ids][:, None], feat_bias],
        axis=-1).sum(1)
    return fm_out + x_biases + params["offset"][0]


def init_params(key, num_users, num_items, num_user_feats, num_item_feats,
                n_factors, rank):
    """Deterministic parameter init mirroring FM.__init__ shapes."""
    ks = jax.random.split(key, 5)

    def kaiming(k, n, d):
        # kaiming_normal_(mode='fan_out') on an [N, D] weight -> std = sqrt(2/N)
        return (jax.random.normal(k, (n, d), jnp.float32)
                * jnp.sqrt(2.0 / n)).astype(jnp.float32)

    params = {
        "embedding_user": kaiming(ks[0], num_users, n_factors),
        "embedding_item": kaiming(ks[1], num_items, n_factors),
        "embedding_item_feats": kaiming(ks[2], num_item_feats, n_factors),
        "embedding_user_feats": kaiming(ks[3], num_user_feats, n_factors),
        "user_bias": jnp.zeros((num_users,), jnp.float32),
        "item_bias": jnp.zeros((num_items,), jnp.float32),
        "user_feat_bias": jnp.zeros((num_user_feats,), jnp.float32),
        "item_feat_bias": jnp.zeros((num_item_feats,), jnp.float32),
        "offset": jnp.zeros((1,), jnp.float32),
        "A": jnp.zeros((num_items, rank), jnp.float32),   # zero-init per __init__
        "B": jnp.zeros((rank, n_factors), jnp.float32),   # zero-init per __init__
    }
    # make biases / A / B non-trivial but deterministic so all terms are exercised
    kb = jax.random.split(ks[4], 6)
    params["user_bias"] = 0.1 * jax.random.normal(kb[0], (num_users,), jnp.float32)
    params["item_bias"] = 0.1 * jax.random.normal(kb[1], (num_items,), jnp.float32)
    params["user_feat_bias"] = 0.1 * jax.random.normal(kb[2], (num_user_feats,), jnp.float32)
    params["item_feat_bias"] = 0.1 * jax.random.normal(kb[3], (num_item_feats,), jnp.float32)
    params["A"] = 0.05 * jax.random.normal(kb[4], (num_items, rank), jnp.float32)
    params["B"] = 0.05 * jax.random.normal(kb[5], (rank, n_factors), jnp.float32)
    params["offset"] = 0.1 * jnp.ones((1,), jnp.float32)
    return params


if __name__ == "__main__":
    # synthetic config (args.n_factors=32, args.rank=4); B=512 gives 2 grid
    # steps of 256 lane-dense rows -> exercises the 2-TensorCore split on v7x.
    B = 512
    num_users, num_items = 200, 300
    num_user_feats, num_item_feats = 24, 40
    n_factors, rank = 32, 4

    key = jax.random.PRNGKey(0)
    kp, ku, ki, kuf, kif = jax.random.split(key, 5)

    params = init_params(kp, num_users, num_items, num_user_feats,
                         num_item_feats, n_factors, rank)

    user_ids = jax.random.randint(ku, (B,), 0, num_users)
    item_ids = jax.random.randint(ki, (B,), 0, num_items)
    # multi-hot style float feature vectors (as the einsum in the module implies)
    user_feats = jax.random.bernoulli(kuf, 0.3, (B, num_user_feats)).astype(jnp.float32)
    item_feats = jax.random.bernoulli(kif, 0.3, (B, num_item_feats)).astype(jnp.float32)

    fwd = jax.jit(functools.partial(fm_forward, tile_b=2048),
                  static_argnames=("train", "stream_dtype"))

    ref = fm_forward_ref(params, user_ids, item_ids, user_feats, item_feats,
                         train=True)

    # f32-streaming path: tight check against the pure-JAX reference
    out_f32 = jax.block_until_ready(
        fwd(params, user_ids, item_ids, user_feats, item_feats,
            train=True, stream_dtype=jnp.float32))
    assert out_f32.shape == (B,)
    assert jnp.allclose(out_f32, ref, atol=2e-3, rtol=2e-3), (out_f32, ref)

    # default bf16-streaming path (memory-bound win): looser tolerance because
    # the streamed embeddings are bf16-quantized before squaring.
    out_bf16 = jax.block_until_ready(
        fwd(params, user_ids, item_ids, user_feats, item_feats, train=True))
    assert jnp.allclose(out_bf16, ref, atol=6e-2, rtol=6e-2), (out_bf16, ref)

    # eval path (train=False)
    out_eval = jax.block_until_ready(
        fwd(params, user_ids, item_ids, user_feats, item_feats,
            train=False, stream_dtype=jnp.float32))
    ref_eval = fm_forward_ref(params, user_ids, item_ids, user_feats,
                              item_feats, train=False)
    assert jnp.allclose(out_eval, ref_eval, atol=2e-3, rtol=2e-3)

    print("KERNEL_OK")
</pallas_src>

<mosaic_0001>
module attributes {stable_mosaic.version = 11 : i64} {
  func.func @fm_kernel(%arg0: i32, %arg1: memref<32x256xf32, #tpu.memory_space<vmem>>, %arg2: memref<64x256xf32, #tpu.memory_space<vmem>>, %arg3: memref<33x64xf32, #tpu.memory_space<vmem>>, %arg4: memref<1x64xf32, #tpu.memory_space<vmem>>, %arg5: memref<1x256xf32, #tpu.memory_space<vmem>>, %arg6: memref<1x256xf32, #tpu.memory_space<vmem>>) attributes {dimension_semantics = [#tpu.dimension_semantics<parallel>], iteration_bounds = array<i64: 2>, scalar_prefetch = 0 : i64, scratch_operands = 0 : i64, tpu.core_type = #tpu.core_type<tc>, window_params = [{transform_indices = @transform_0, window_bounds = array<i64: 32, 256>}, {transform_indices = @transform_1, window_bounds = array<i64: 64, 256>}, {pipeline_mode = #tpu.pipeline_mode<synchronous>, transform_indices = @transform_2, window_bounds = array<i64: 33, 64>}, {pipeline_mode = #tpu.pipeline_mode<synchronous>, transform_indices = @transform_3, window_bounds = array<i64: 1, 64>}, {transform_indices = @transform_4, window_bounds = array<i64: 1, 256>}, {transform_indices = @transform_5, window_bounds = array<i64: 1, 256>}]} {
    %c0 = arith.constant 0 : index
    %c0_0 = arith.constant 0 : index
    %0 = vector.load %arg1[%c0, %c0_0] : memref<32x256xf32, #tpu.memory_space<vmem>>, vector<32x256xf32>
    %c0_1 = arith.constant 0 : index
    %c0_2 = arith.constant 0 : index
    %1 = vector.load %arg2[%c0_1, %c0_2] : memref<64x256xf32, #tpu.memory_space<vmem>>, vector<64x256xf32>
    %c0_3 = arith.constant 0 : index
    %c0_4 = arith.constant 0 : index
    %2 = vector.load %arg3[%c0_3, %c0_4] : memref<33x64xf32, #tpu.memory_space<vmem>>, vector<33x64xf32>
    %cst = arith.constant dense<0.000000e+00> : vector<33x256xf32>
    %3 = tpu.matmul %2, %1, %cst {dimension_numbers = #tpu.dot_dimension_numbers<[1], [0], [0], [1], [0, 0, 1, 1], [], []>} : vector<33x64xf32>, vector<64x256xf32>, vector<33x256xf32> -> vector<33x256xf32>
    %4 = vector.extract_strided_slice %3 {offsets = [0, 0], sizes = [32, 256], strides = [1, 1]} : vector<33x256xf32> to vector<32x256xf32>
    %5 = arith.addf %0, %4 : vector<32x256xf32>
    %6 = arith.mulf %5, %5 : vector<32x256xf32>
    %cst_5 = arith.constant dense<0.000000e+00> : vector<256xf32>
    %7 = vector.multi_reduction <add>, %6, %cst_5 [0] : vector<32x256xf32> to vector<256xf32>
    %8 = vector.shape_cast %7 : vector<256xf32> to vector<1x256xf32>
    %c0_6 = arith.constant 0 : index
    %c0_7 = arith.constant 0 : index
    %9 = vector.load %arg4[%c0_6, %c0_7] : memref<1x64xf32, #tpu.memory_space<vmem>>, vector<1x64xf32>
    %10 = arith.mulf %1, %1 : vector<64x256xf32>
    %cst_8 = arith.constant dense<0.000000e+00> : vector<1x256xf32>
    %11 = tpu.matmul %9, %10, %cst_8 {dimension_numbers = #tpu.dot_dimension_numbers<[1], [0], [0], [1], [0, 0, 1, 1], [], []>} : vector<1x64xf32>, vector<64x256xf32>, vector<1x256xf32> -> vector<1x256xf32>
    %12 = vector.extract_strided_slice %3 {offsets = [32, 0], sizes = [1, 256], strides = [1, 1]} : vector<33x256xf32> to vector<1x256xf32>
    %13 = arith.subf %8, %11 : vector<1x256xf32>
    %cst_9 = arith.constant 5.000000e-01 : f32
    %14 = vector.broadcast %cst_9 : f32 to vector<1x256xf32>
    %15 = arith.mulf %14, %13 : vector<1x256xf32>
    %16 = arith.addf %15, %12 : vector<1x256xf32>
    %c0_10 = arith.constant 0 : index
    %c0_11 = arith.constant 0 : index
    %17 = vector.load %arg5[%c0_10, %c0_11] : memref<1x256xf32, #tpu.memory_space<vmem>>, vector<1x256xf32>
    %18 = arith.addf %16, %17 : vector<1x256xf32>
    %c0_12 = arith.constant 0 : index
    %c0_13 = arith.constant 0 : index
    %19 = vector.load %arg6[%c0_12, %c0_13] : memref<1x256xf32, #tpu.memory_space<vmem>>, vector<1x256xf32>
    tpu.vector_store %arg6[%c0_12, %c0_13], %18 {strides = array<i32>} : memref<1x256xf32, #tpu.memory_space<vmem>>, vector<1x256xf32>,
    return
  }
  func.func @transform_0(%arg0: i32) -> (i32, i32) {
    %c0_i32 = arith.constant 0 : i32
    %c0_i32_0 = arith.constant 0 : i32
    return %c0_i32, %arg0 : i32, i32
  }
  func.func @transform_1(%arg0: i32) -> (i32, i32) {
    %c0_i32 = arith.constant 0 : i32
    %c0_i32_0 = arith.constant 0 : i32
    return %c0_i32, %arg0 : i32, i32
  }
  func.func @transform_2(%arg0: i32) -> (i32, i32) {
    %c0_i32 = arith.constant 0 : i32
    %c0_i32_0 = arith.constant 0 : i32
    %c0_i32_1 = arith.constant 0 : i32
    return %c0_i32, %c0_i32_0 : i32, i32
  }
  func.func @transform_3(%arg0: i32) -> (i32, i32) {
    %c0_i32 = arith.constant 0 : i32
    %c0_i32_0 = arith.constant 0 : i32
    %c0_i32_1 = arith.constant 0 : i32
    return %c0_i32, %c0_i32_0 : i32, i32
  }
  func.func @transform_4(%arg0: i32) -> (i32, i32) {
    %c0_i32 = arith.constant 0 : i32
    %c0_i32_0 = arith.constant 0 : i32
    return %c0_i32, %arg0 : i32, i32
  }
  func.func @transform_5(%arg0: i32) -> (i32, i32) {
    %c0_i32 = arith.constant 0 : i32
    %c0_i32_0 = arith.constant 0 : i32
    return %c0_i32, %arg0 : i32, i32
  }
}

</mosaic_0001>

<bundles_post_ra>
// kernel: fm_forward.1
= control target key start
LH: loop header
LB: loop body
LE: loop exit
PB: predicated region body
PF: predicated region fallthrough
CT: control target
= control target key end

     0   :  { %10 = vsyncpa [#allocation5], 0  ;;  %s1156_s0 = inlined_call_operand.vmem [shape: f32[32,512], index: 0, kind: input, shape index: {}]   ;;  %s1157_s1 = inlined_call_operand.vmem [shape: f32[64,512], index: 1, kind: input, shape index: {}]   ;;  %s1158_s2 = inlined_call_operand.vmem [shape: f32[33,64], index: 2, kind: input, shape index: {}]   ;;  %s1159_s3 = inlined_call_operand.vmem [shape: f32[1,64], index: 3, kind: input, shape index: {}]   ;;  %s1160_s4 = inlined_call_operand.vmem [shape: f32[1,512], index: 4, kind: input, shape index: {}]   ;;  %s1161_s5 = inlined_call_operand.hbm [shape: f32[1,512], index: 5, kind: output, shape index: {}]  }
   0x1   :  { %12 = vsyncpa [#allocation5 + $0x1], 0  ;;  %s962_s18 = smov 0   ;;  %s964_s19 = smov 0  }
   0x2   :  { %s966_s20 = smov 0   ;;  %s968_s21 = smov 0  }
   0x3 LB: > { %s983_s22 = sadd.s32 4294967295, %s927_s21   ;;  %s764_s23 = sadd.s32 4294967294, %s927_s21   ;;  %s927_s21 = sphi %s968_s21, %s1168_s21   ;;  %s923_s20 = sphi %s966_s20, %s1167_s20   ;;  %s919_s19 = sphi %s964_s19, %s1166_s19   ;;  %s915_s18 = sphi %s962_s18, %s1165_s18  }
   0x4   : > { %s987_s24 = sadd.s32 1, %s927_s21   ;;  %s25_s25 = sadd.s32 1, %s923_s20 }
   0x5   : > { %s22_s26 = ssub.s32 %s927_s21, %s987_s24  ;;  %p32_p0 = scmp.ne.s32.totalorder %s923_s20, %s919_s19 }
   0x6   : > { %p23_p1 = scmp.eq.s32.totalorder %s22_s26, 0  ;;  %p33_p2 = scmp.eq.s32.totalorder %s927_s21, 0 }
   0x7   : > { %p156_p3 = scmp.eq.s32.totalorder %s983_s22, 1  ;;  %p161_p4 = scmp.ne.s32.totalorder %s919_s19, %s915_s18 }
   0x8   : > { %s999_s27 = scalar_select %p23_p1, %s923_s20, %s25_s25  }
   0x9   : > { %p1001_p5 = por %p33_p2, %p32_p0  ;;  %p1005_p6 = por %p156_p3, %p32_p0 }
   0xa   : > { %p162_p7 = scmp.eq.s32.totalorder %s764_s23, 1  ;;  %p766_p9 = scmp.ge.s32.totalorder %s927_s21, 2 }
   0xc   : > { %p1009_p8 = por %p162_p7, %p161_p4  ;;  %184 = sbr.rel (%p766_p9) target bundleno = 39 (0x27), region = 24 }
  0x13   : > { %187 = sbr.rel (!%p1001_p5) target bundleno = 27 (0x1b), region = 28  ;;  %s189_s6 = sand.u32 (%p1001_p5), 1, %s923_s20  }
  0x14   : > { %s789_s7 = sshll.u32 (%p1001_p5), %s927_s21, 4  ;;  %s767_s8 = sshll.u32 (%p1001_p5), %s189_s6, 6 }
  0x15   : > { %s194_s11 = scalar_lea.vmem (%p1001_p5), %s1156_s0, %s789_s7  ;;  %s191_s12 = scalar_lea.vmem (%p1001_p5), [#allocation2], %s767_s8 }
  0x16   : > { %v207_v0 = vld [vmem:[%s194_s11] sm:$0xff] (%p1001_p5)  ;;  %v209_v1 = vld [vmem:[%s194_s11 + $0x8] sm:$0xff] (%p1001_p5) }
  0x17   : > { %v211_v2 = vld [vmem:[%s194_s11 + $0x20] sm:$0xff] (%p1001_p5)  ;;  %208 = vst [vmem:[%s191_s12] sm:$0xff] (%p1001_p5), %v207_v0  ;;  %210 = vst [vmem:[%s191_s12 + $0x8] sm:$0xff] (%p1001_p5), %v209_v1  ;;  %v213_v3 = vld [vmem:[%s194_s11 + $0x28] sm:$0xff] (%p1001_p5) }
  0x18   : > { %212 = vst [vmem:[%s191_s12 + $0x10] sm:$0xff] (%p1001_p5), %v211_v2  ;;  %v215_v4 = vld [vmem:[%s194_s11 + $0x40] sm:$0xff] (%p1001_p5)  ;;  %v217_v5 = vld [vmem:[%s194_s11 + $0x48] sm:$0xff] (%p1001_p5)  ;;  %214 = vst [vmem:[%s191_s12 + $0x18] sm:$0xff] (%p1001_p5), %v213_v3 }
  0x19   : > { %216 = vst [vmem:[%s191_s12 + $0x20] sm:$0xff] (%p1001_p5), %v215_v4  ;;  %218 = vst [vmem:[%s191_s12 + $0x28] sm:$0xff] (%p1001_p5), %v217_v5  ;;  %v219_v6 = vld [vmem:[%s194_s11 + $0x60] sm:$0xff] (%p1001_p5)  ;;  %v221_v7 = vld [vmem:[%s194_s11 + $0x68] sm:$0xff] (%p1001_p5) }
  0x1a   : > { %220 = vst [vmem:[%s191_s12 + $0x30] sm:$0xff] %v219_v6  ;;  %222 = vst [vmem:[%s191_s12 + $0x38] sm:$0xff] %v221_v7 }
  0x1b PF: > { %228 = sbr.rel (!%p1001_p5) target bundleno = 39 (0x27), region = 51  ;;  %s230_s13 = sand.u32 (%p1001_p5), 1, %s923_s20  }
  0x1c   : > { %s790_s14 = sshll.u32 (%p1001_p5), %s927_s21, 4  ;;  %s770_s15 = sshll.u32 (%p1001_p5), %s230_s13, 7 }
  0x1d   : > { %s1030_s23 = scalar_lea.vmem (%p1001_p5), %s1157_s1, %s790_s14  ;;  %s232_s25 = scalar_lea.vmem (%p1001_p5), [#allocation3], %s770_s15 }
  0x1e   : > { %v248_v8 = vld [vmem:[%s1030_s23] sm:$0xff] (%p1001_p5)  ;;  %v250_v9 = vld [vmem:[%s1030_s23 + $0x8] sm:$0xff] (%p1001_p5) }
  0x1f   : > { %v252_v10 = vld [vmem:[%s1030_s23 + $0x20] sm:$0xff] (%p1001_p5)  ;;  %249 = vst [vmem:[%s232_s25] sm:$0xff] (%p1001_p5), %v248_v8  ;;  %251 = vst [vmem:[%s232_s25 + $0x8] sm:$0xff] (%p1001_p5), %v250_v9  ;;  %v254_v11 = vld [vmem:[%s1030_s23 + $0x28] sm:$0xff] (%p1001_p5) }
  0x20   : > { %253 = vst [vmem:[%s232_s25 + $0x10] sm:$0xff] (%p1001_p5), %v252_v10  ;;  %v256_v12 = vld [vmem:[%s1030_s23 + $0x40] sm:$0xff] (%p1001_p5)  ;;  %v258_v13 = vld [vmem:[%s1030_s23 + $0x48] sm:$0xff] (%p1001_p5)  ;;  %255 = vst [vmem:[%s232_s25 + $0x18] sm:$0xff] (%p1001_p5), %v254_v11 }
  0x21   : > { %257 = vst [vmem:[%s232_s25 + $0x20] sm:$0xff] (%p1001_p5), %v256_v12  ;;  %259 = vst [vmem:[%s232_s25 + $0x28] sm:$0xff] (%p1001_p5), %v258_v13  ;;  %v260_v14 = vld [vmem:[%s1030_s23 + $0x60] sm:$0xff] (%p1001_p5)  ;;  %v262_v15 = vld [vmem:[%s1030_s23 + $0x68] sm:$0xff] (%p1001_p5) }
  0x22   : > { %v264_v16 = vld [vmem:[%s1030_s23 + $0x80] sm:$0xff]  ;;  %261 = vst [vmem:[%s232_s25 + $0x30] sm:$0xff] %v260_v14  ;;  %263 = vst [vmem:[%s232_s25 + $0x38] sm:$0xff] %v262_v15  ;;  %v266_v17 = vld [vmem:[%s1030_s23 + $0x88] sm:$0xff] }
  0x23   : > { %265 = vst [vmem:[%s232_s25 + $0x40] sm:$0xff] %v264_v16  ;;  %v268_v18 = vld [vmem:[%s1030_s23 + $0xa0] sm:$0xff]  ;;  %v270_v19 = vld [vmem:[%s1030_s23 + $0xa8] sm:$0xff]  ;;  %267 = vst [vmem:[%s232_s25 + $0x48] sm:$0xff] %v266_v17 }
  0x24   : > { %269 = vst [vmem:[%s232_s25 + $0x50] sm:$0xff] %v268_v18  ;;  %271 = vst [vmem:[%s232_s25 + $0x58] sm:$0xff] %v270_v19  ;;  %v272_v20 = vld [vmem:[%s1030_s23 + $0xc0] sm:$0xff]  ;;  %v274_v21 = vld [vmem:[%s1030_s23 + $0xc8] sm:$0xff] }
  0x25   : > { %v276_v22 = vld [vmem:[%s1030_s23 + $0xe0] sm:$0xff]  ;;  %273 = vst [vmem:[%s232_s25 + $0x60] sm:$0xff] %v272_v20  ;;  %275 = vst [vmem:[%s232_s25 + $0x68] sm:$0xff] %v274_v21  ;;  %v278_v23 = vld [vmem:[%s1030_s23 + $0xe8] sm:$0xff] }
  0x26   : > { %277 = vst [vmem:[%s232_s25 + $0x70] sm:$0xff] %v276_v22  ;;  %279 = vst [vmem:[%s232_s25 + $0x78] sm:$0xff] %v278_v23 }
  0x27 PF: > { %p773_p10 = scmp.ge.s32.totalorder %s927_s21, 1  ;;  %p292_p11 = scmp.lt.s32.totalorder %s927_s21, 3 }
  0x29   : > { %p293_p12 = pnand %p773_p10, %p292_p11 }
  0x2a   : > { %s1051_s26 = sand.u32 (!%p293_p12), 1, %s919_s19   ;;  %v929_v24 = vmov (!%p293_p12), 0.0   ;;  %v373_v9 = vld [vmem:[%s1158_s2] sm:$0xff] (!%p293_p12)  ;;  %vm378_vm0 = vcmask (!%p293_p12), 523264   ;;  %v374_v11 = vld [vmem:[%s1158_s2 + $0x8] sm:$0xff] (!%p293_p12)  ;;  %v375_v12 = vld [vmem:[%s1158_s2 + $0x10] sm:$0xff] (!%p293_p12) }
  0x2b   : > { %296 = sbr.rel (%p293_p12) target bundleno = 335 (0x14f), region = 78  ;;  %s775_s28 = sshll.u32 (!%p293_p12), %s1051_s26, 7  ;;  %458 = vmatprep.mubr.f32.mxu0 (!%p293_p12), %v929_v24  ;;  %607 = vmatprep.mubr.f32.mxu1 (!%p293_p12), %v929_v24  ;;  %v523_v10 = vld [vmem:[%s1159_s3] sm:$0x1] (!%p293_p12)  ;;  %v376_v13 = vld [vmem:[%s1158_s2 + $0x18] sm:$0xff] (!%p293_p12) }
  0x2c   : > { %s1056_s6 = scalar_lea.vmem (!%p293_p12), [#allocation3], %s775_s28  ;;  %v377_v14 = vld [vmem:[%s1158_s2 + $0x20] sm:$0x1] (!%p293_p12)  ;;  %s774_s25 = sshll.u32 (!%p293_p12), %s1051_s26, 6 }
  0x2d   : > { %v358_v25 = vld [vmem:[%s1056_s6 + $0x8] sm:$0xff] (!%p293_p12)  ;;  %v360_v26 = vld [vmem:[%s1056_s6 + $0x18] sm:$0xff] (!%p293_p12)  ;;  %v357_v27 = vld [vmem:[%s1056_s6] sm:$0xff] (!%p293_p12)  ;;  %s301_s28 = scalar_lea.vmem (!%p293_p12), [#allocation2], %s774_s25  ;;  %s776_s10 = sshll.u32 (!%p293_p12), %s1051_s26, 1 }
  0x2e   : > { %v792_v28 = vpack.c.bf16 (!%p293_p12), %v360_v26, %v358_v25  ;;  %v359_v29 = vld [vmem:[%s1056_s6 + $0x10] sm:$0xff] (!%p293_p12)  ;;  %v362_v30 = vld [vmem:[%s1056_s6 + $0x28] sm:$0xff] (!%p293_p12)  ;;  %v364_v31 = vld [vmem:[%s1056_s6 + $0x38] sm:$0xff] (!%p293_p12)  ;;  %v525_v32 = vmul.f32 (!%p293_p12), %v358_v25, %v358_v25  ;;  %v527_v33 = vmul.f32 (!%p293_p12), %v360_v26, %v360_v26  ;;  %v524_v34 = vmul.f32 (!%p293_p12), %v357_v27, %v357_v27  ;;  %s791_s11 = sshll.u32 (!%p293_p12), %s983_s22, 5  ;;  %s340_s12 = scalar_lea.vmem (!%p293_p12), [#allocation4], %s776_s10 }
  0x2f   : > { %v794_v35 = vpack.c.bf16 (!%p293_p12), %v359_v29, %v357_v27  ;;  %v796_v36 = vpack.c.bf16 (!%p293_p12), %v364_v31, %v362_v30  ;;  %v361_v37 = vld [vmem:[%s1056_s6 + $0x20] sm:$0xff] (!%p293_p12)  ;;  %v363_v38 = vld [vmem:[%s1056_s6 + $0x30] sm:$0xff] (!%p293_p12)  ;;  %v366_v39 = vld [vmem:[%s1056_s6 + $0x48] sm:$0xff] (!%p293_p12)  ;;  %v526_v40 = vmul.f32 (!%p293_p12), %v359_v29, %v359_v29  ;;  %v529_v41 = vmul.f32 (!%p293_p12), %v362_v30, %v362_v30  ;;  %s672_s13 = sshll.u32 (!%p293_p12), %s340_s12, 4  ;;  %s1112_s16 = scalar_lea.hbm (!%p293_p12), %s1161_s5, %s791_s11  ;;  %s1114_s13 = int_to_ptr.vmem [resolvable:$true] %s672_s13 }
  0x30   : > { %793 = vmatprep.subr.bf16.mxu0 (!%p293_p12), %v792_v28  ;;  %v368_v42 = vld [vmem:[%s1056_s6 + $0x58] sm:$0xff] (!%p293_p12)  ;;  %v808_v43 = vpack.c.bf16 (!%p293_p12), %v527_v33, %v525_v32  ;;  %v531_v44 = vmul.f32 (!%p293_p12), %v364_v31, %v364_v31  ;;  %v528_v45 = vmul.f32 (!%p293_p12), %v361_v37, %v361_v37  ;;  %v798_v46 = vpack.c.bf16 (!%p293_p12), %v363_v38, %v361_v37  ;;  %v365_v50 = vld [vmem:[%s1056_s6 + $0x40] sm:$0xff] (!%p293_p12)  ;;  %v367_v51 = vld [vmem:[%s1056_s6 + $0x50] sm:$0xff] (!%p293_p12)  ;;  %s658_s17 = scalar_lea.sflag (!%p293_p12), [#allocation5], %s1051_s26  ;;  %s865_s23 = scalar_lea.vmem (!%p293_p12), %s1114_s13, 32 }
  0x31   : > { %795 = vmatpush1.bf16.msra.mxu0 (!%p293_p12), %v794_v35  ;;  %v810_v47 = vpack.c.bf16 (!%p293_p12), %v526_v40, %v524_v34  ;;  %v530_v48 = vmul.f32 (!%p293_p12), %v363_v38, %v363_v38  ;;  %v800_v49 = vpack.c.bf16 (!%p293_p12), %v368_v42, %v366_v39  ;;  %v533_v53 = vmul.f32 (!%p293_p12), %v366_v39, %v366_v39  ;;  %v370_v54 = vld [vmem:[%s1056_s6 + $0x68] sm:$0xff] (!%p293_p12)  ;;  %v372_v55 = vld [vmem:[%s1056_s6 + $0x78] sm:$0xff] (!%p293_p12)  ;;  %v369_v1 = vld [vmem:[%s1056_s6 + $0x60] sm:$0xff] (!%p293_p12)  ;;  %p866_p0 = scmp.ne.s32.totalorder (!%p293_p12), %s1114_s13, %s865_s23 }
  0x32   : > { %797 = vmatprep.subr.bf16.mxu0 %v796_v36  ;;  %809 = vmatprep.subr.bf16.mxu1 %v808_v43  ;;  %v812_v52 = vpack.c.bf16 %v531_v44, %v529_v41  ;;  %v535_v57 = vmul.f32 %v368_v42, %v368_v42  ;;  %v532_v58 = vmul.f32 %v365_v50, %v365_v50  ;;  %v371_v2 = vld [vmem:[%s1056_s6 + $0x70] sm:$0xff]  ;;  %v349_v15 = vld [vmem:[%s301_s28] sm:$0xff]  ;;  %v350_v17 = vld [vmem:[%s301_s28 + $0x8] sm:$0xff]  ;;  %s777_s6 = sshll.u32 %s983_s22, 1  ;;  %s931_s22 = smov [#allocation4]  }
  0x33   : > { %811 = vmatpush1.bf16.msra.mxu1 %v810_v47  ;;  %v814_v56 = vpack.c.bf16 %v530_v48, %v528_v45  ;;  %v534_v59 = vmul.f32 %v367_v51, %v367_v51  ;;  %v537_v60 = vmul.f32 %v370_v54, %v370_v54  ;;  %v539_v61 = vmul.f32 %v372_v55, %v372_v55  ;;  %v351_v19 = vld [vmem:[%s301_s28 + $0x10] sm:$0xff]  ;;  %v352_v22 = vld [vmem:[%s301_s28 + $0x18] sm:$0xff]  ;;  %v353_v29 = vld [vmem:[%s301_s28 + $0x20] sm:$0xff]  ;;  %p344_p13 = scmp.lt.s32.totalorder %s777_s6, 3  ;;  %p867_p1 = pnand %p866_p0, %p1005_p6 }
  0x34   : > { %813 = vmatprep.subr.bf16.mxu1 %v812_v52  ;;  %v802_v62 = vpack.c.bf16 %v367_v51, %v365_v50  ;;  %v816_v63 = vpack.c.bf16 %v535_v57, %v533_v53  ;;  %v804_v0 = vpack.c.bf16 %v372_v55, %v370_v54  ;;  %v536_v4 = vmul.f32 %v369_v1, %v369_v1  ;;  %v354_v32 = vld [vmem:[%s301_s28 + $0x28] sm:$0xff]  ;;  %v355_v41 = vld [vmem:[%s301_s28 + $0x30] sm:$0xff]  ;;  %v356_v43 = vld [vmem:[%s301_s28 + $0x38] sm:$0xff]  ;;  %s869_s25 = sshll.u32 %s931_s22, 4  ;;  %s870_s25 = int_to_ptr.vmem [resolvable:$false] %s869_s25 }
  0x35   : > { %799 = vmatpush1.bf16.msra.mxu0 %v798_v46  ;;  %v818_v3 = vpack.c.bf16 %v534_v59, %v532_v58  ;;  %v538_v5 = vmul.f32 %v371_v2, %v371_v2  ;;  %v820_v6 = vpack.c.bf16 %v539_v61, %v537_v60  ;;  %v806_v7 = vpack.c.bf16 %v371_v2, %v369_v1  ;;  %s1170_s6 = smov (!%p344_p13, %s777_s6), 3  ;;  %p868_p2 = pneg %p867_p1 }
  0x36   : > { %801 = vmatprep.subr.bf16.mxu0 %v800_v49  ;;  %v622_v60 = vlaneseq  ;;  %s346_s9 = scalar_lea.vmem %s1160_s4, %s1170_s6  ;;  %s871_s28 = scalar_lea.vmem %s870_s25, 64 }
  0x37   : > { %815 = vmatpush1.bf16.msra.mxu1 %v814_v56  ;;  %v822_v8 = vpack.c.bf16 %v538_v5, %v536_v4  ;;  %p872_p3 = scmp.lt.s32.totalorder %s1114_s13, %s870_s25  ;;  %p873_p4 = scmp.lt.s32.totalorder %s871_s28, %s865_s23 }
  0x38   : > { %817 = vmatprep.subr.bf16.mxu1 %v816_v63  ;;  %v623_v1 = vshrl.u32 %v622_v60, 7  ;;  %vm654_vm1 = vcmp.lt.s32.totalorder %v622_v60, 256 }
  0x39   : > { %803 = vmatpush1.bf16.msra.mxu0 %v802_v62  ;;  %p874_p5 = por %p873_p4, %p872_p3 }
  0x3a   : > { %805 = vmatprep.subr.bf16.mxu0 %v804_v0 }
  0x3b   : > { %819 = vmatpush1.bf16.msra.mxu1 %v818_v3  ;;  %p875_p7 = pnand %p874_p5, %p868_p2 }
  0x3c   : > { %821 = vmatprep.subr.bf16.mxu1 %v820_v6  ;;  %v624_v6 = vsub.s32 0, %v623_v1 }
  0x3d   : > { %807 = vmatpush1.bf16.msra.mxu0 %v806_v7 }
  0x3f   : > { %823 = vmatpush1.bf16.msra.mxu1 %v822_v8  ;;  %v620_v8 = vld [vmem:[%s346_s9] sm:$0x3] }
  0x40   : > { %778 = vmatmul.mubr.msk.f32.vlgmr.msra.gmra.mrb[0].mxu0 %vm378_vm0, %v373_v9  ;;  %v628_v9 = vsub.s32 1, %v623_v1 }
  0x41   : > { %464 = vmatprep.mubr.f32.mxu0 %v929_v24 }
  0x42   : > { %783 = vmatmul.mubr.msk.f32.vlgmr.msra.gmra.mrb[0].mxu1 %vm378_vm0, %v523_v10  ;;  %v930_v10 = vmov 1966171168  }
  0x44   : > { %779 = vmatmul.mubr.msk.f32.gmra.mrb[2].mxu0 %vm378_vm0, %v374_v11  ;;  %v638_v11 = vunpack.c.l.s4 %v930_v10 }
  0x45   : > { %470 = vmatprep.mubr.f32.mxu0 %v929_v24 }
  0x48   : > { %780 = vmatmul.mubr.msk.f32.gmra.mrb[4].mxu0 %vm378_vm0, %v375_v12 }
  0x49   : > { %476 = vmatprep.mubr.f32.mxu0 %v929_v24 }
  0x4c   : > { %781 = vmatmul.mubr.msk.f32.gmra.mrb[6].mxu0 %vm378_vm0, %v376_v13 }
  0x4d   : > { %482 = vmatprep.mubr.f32.mxu0 %v929_v24 }
  0x50   : > { %782 = vmatmul.mubr.msk.f32.gmra.mrb[8].mxu0 %vm378_vm0, %v377_v14 }
 0x113   : > { %v460_v16 = vpop.f32.mrb[0].mxu0 }
 0x114   : > { %v462_v18 = vpop.f32.mrb[1].mxu0  ;;  %v489_v21 = vadd.f32 %v460_v16, %v349_v15  ;;  %v625_v15 = vrot.slane %v620_v8, %v624_v6 }
 0x115   : > { %v609_v20 = vpop.f32.mrb[0].mxu1  ;;  %v490_v25 = vadd.f32 %v462_v18, %v350_v17  ;;  %v629_v17 = vrot.slane %v620_v8, %v628_v9  ;;  %v639_v18 = vunpack.c.0.s8 %v638_v11 }
 0x116   : > { %v611_v23 = vpop.f32.mrb[1].mxu1  ;;  %v497_v30 = vmul.f32 %v489_v21, %v489_v21 }
 0x117   : > { %v466_v26 = vpop.f32.mrb[2].mxu0  ;;  %v498_v33 = vmul.f32 %v490_v25, %v490_v25 }
 0x118   : > { %v491_v24 = vadd.f32 %v466_v26, %v351_v19  ;;  %v468_v27 = vpop.f32.mrb[3].mxu0  ;;  %v642_v26 = vsub.s32 %v639_v18, %v623_v1 }
 0x119   : > { %v492_v28 = vadd.f32 %v468_v27, %v352_v22 }
 0x11a   : > { %v499_v31 = vmul.f32 %v491_v24, %v491_v24 }
 0x11b   : > { %v500_v34 = vmul.f32 %v492_v28, %v492_v28  ;;  %v472_v35 = vpop.f32.mrb[4].mxu0 }
 0x11c   : > { %v505_v36 = vadd.f32 %v499_v31, %v497_v30  ;;  %v493_v37 = vadd.f32 %v472_v35, %v353_v29  ;;  %v474_v38 = vpop.f32.mrb[5].mxu0 }
 0x11d   : > { %v514_v39 = vadd.f32 %v500_v34, %v498_v33  ;;  %v494_v40 = vadd.f32 %v474_v38, %v354_v32 }
 0x11e   : > { %v501_v42 = vmul.f32 %v493_v37, %v493_v37 }
 0x11f   : > { %v502_v44 = vmul.f32 %v494_v40, %v494_v40  ;;  %v478_v45 = vpop.f32.mrb[6].mxu0 }
 0x120   : > { %v506_v46 = vadd.f32 %v505_v36, %v501_v42  ;;  %v495_v47 = vadd.f32 %v478_v45, %v355_v41  ;;  %v480_v48 = vpop.f32.mrb[7].mxu0 }
 0x121   : > { %v515_v49 = vadd.f32 %v514_v39, %v502_v44  ;;  %v496_v50 = vadd.f32 %v480_v48, %v356_v43 }
 0x122   : > { %v503_v51 = vmul.f32 %v495_v47, %v495_v47 }
 0x123   : > { %v504_v52 = vmul.f32 %v496_v50, %v496_v50  ;;  %v484_v53 = vpop.f32.mrb[8].mxu0 }
 0x124   : > { %v507_v54 = vadd.f32 %v506_v46, %v503_v51  ;;  %v486_v55 = vpop.f32.mrb[9].mxu0 }
 0x125   : > { %v516_v56 = vadd.f32 %v515_v49, %v504_v52 }
 0x126   : > { %v508_v57 = vrot.slane %v507_v54, 4 }
 0x127   : > { %v517_v58 = vrot.slane %v516_v56, 4 }
 0x128   : > { %v509_v59 = vadd.f32 %v508_v57, %v507_v54 }
 0x129   : > { %v518_v61 = vadd.f32 %v517_v58, %v516_v56 }
 0x12a   : > { %v510_v62 = vrot.slane %v509_v59, 2 }
 0x12b   : > { %v519_v63 = vrot.slane %v518_v61, 2 }
 0x12c   : > { %v511_v0 = vadd.f32 %v510_v62, %v509_v59 }
 0x12d   : > { %v520_v2 = vadd.f32 %v519_v63, %v518_v61 }
 0x12e   : > { %v512_v3 = vrot.slane %v511_v0, 1 }
 0x12f   : > { %v521_v4 = vrot.slane %v520_v2, 1 }
 0x130   : > { %v513_v5 = vadd.f32 %v512_v3, %v511_v0 }
 0x131   : > { %v522_v7 = vadd.f32 %v521_v4, %v520_v2 }
 0x132   : > { %v614_v12 = vsub.f32 %v513_v5, %v609_v20 }
 0x133   : > { %v615_v13 = vsub.f32 %v522_v7, %v611_v23 }
 0x134   : > { %v616_v14 = vmul.f32 0.5, %v614_v12 }
 0x135   : > { %v617_v16 = vmul.f32 0.5, %v615_v13 }
 0x136   : > { %v618_v19 = vadd.f32 %v616_v14, %v484_v53 }
 0x137   : > { %v619_v21 = vadd.f32 %v617_v16, %v486_v55 }
 0x138   : > { %v632_v22 = vadd.f32 %v625_v15, %v618_v19 }
 0x139   : > { %v633_v25 = vadd.f32 %v629_v17, %v619_v21 }
 0x13b   : > { %v636_v24 = vcombine.low %v632_v22, %v633_v25 }
 0x13d   : > { %v643_v27 = vrot.slane %v636_v24, %v642_v26 }
 0x13f   : > { %v650_v20 = vrot.slane %v643_v27, %v642_v26 }
 0x141   : > { %656 = vst.msk [vmem:[%s340_s12] sm:$0x3] %vm654_vm1, %v650_v20 }
 0x142   : > { %878 = shalt.err (!%p875_p7)
}
 0x143   : > { %s879_s26 = scalar_lea.hbm %s1112_s16, 32  ;;  %s883_s8 = scalar_lea.hbm %s1161_s5, 64 }
 0x144   : > { %p880_p10 = scmp.ne.s32.totalorder %s1112_s16, %s879_s26  ;;  %p884_p13 = scmp.lt.u32.totalorder %s1112_s16, %s1161_s5 }
 0x145   : > { %p885_p0 = scmp.lt.u32.totalorder %s883_s8, %s879_s26  ;;  %p887_p2 = scmp.lt.u32.totalorder %s879_s26, %s1112_s16 }
 0x146   : > { %p881_p11 = pnand %p880_p10, %p1005_p6 }
 0x147   : > { %p886_p1 = por %p885_p0, %p884_p13 }
 0x148   : > { %p882_p12 = pneg %p881_p11 }
 0x149   : > { %p888_p3 = por %p887_p2, %p886_p1 }
 0x14b   : > { %p889_p4 = pnand %p888_p3, %p882_p12 }
 0x14d   : > { %892 = shalt.err (!%p889_p4)
}
 0x14e   : > { %824 = dma.vmem_to_hbm [thread:$0]  (%p1005_p6), %s1114_s13, 32, %s1112_s16, %s658_s17  }
 0x14f PF: > { %s684_s11 = sand.u32 1, %s915_s18   ;;  %p827_p5 = pnand %p766_p9, %p1009_p8 }
 0x150   : > { %s685_s12 = scalar_lea.sflag [#allocation5], %s684_s11 }
 0x151   : > { %910 = dma.done.wait (!%p827_p5), %s685_s12, 32  }
 0x152   : > { %912 = vsyncadd (!%p827_p5), %s685_s12, 4294967264  ;;  %p15_p7 = scmp.ge.s32.totalorder %s987_s24, 4   ;;  %s1165_s18 = smov %s919_s19 }
 0x153   : > { %s1166_s19 = smov %s923_s20  ;;  %s1167_s20 = smov %s999_s27 }
 0x154   : > { %s1168_s21 = smov %s987_s24  ;;  %17 = sbr.rel (!%p15_p7) target bundleno = 3 (0x3), region = 137 }
 0x15b   :  { %690 = vsyncpa [#allocation5], 1 }
 0x15c   :  { %692 = vsyncpa [#allocation5 + $0x1], 1 }

</bundles_post_ra>
